<compile_context>
chip_gen: v7x
topology: tpu7x:2x2x1
jax: 0.10.0
libtpu: 0.0.40
codegen_flags: <defaults>
</compile_context>

<pallas_src>
import jax
import jax.numpy as jnp
from jax.experimental import pallas as pl
from jax.experimental.pallas import tpu as pltpu

EPS = 1e-5


def _bn_classifier_kernel(x_ref, gamma_ref, beta_ref, wt_ref, feat_ref, cls_ref):
    x = x_ref[...].astype(jnp.float32)                       # (B, D)
    inv_b = jnp.float32(1.0 / x.shape[0])

    # One-pass batch statistics (f32): mean = E[x], var = E[x^2] - mean^2
    # (biased variance, matching BatchNorm1d train-mode normalization).
    s = jnp.sum(x, axis=0, keepdims=True)                    # (1, D)
    sq = jnp.sum(x * x, axis=0, keepdims=True)               # (1, D)
    mean = s * inv_b                                         # (1, D)
    var = sq * inv_b - mean * mean                           # (1, D)
    inv_std = jax.lax.rsqrt(var + EPS)                       # (1, D)

    # Fold the affine into a per-feature scale/shift: 2 VALU ops/elem on (B,D).
    gamma = gamma_ref[...].astype(jnp.float32)               # (1, D)
    beta = beta_ref[...].astype(jnp.float32)                 # (1, D)
    scale = gamma * inv_std                                  # (1, D)
    shift = beta - mean * scale                              # (1, D)
    feature = x * scale + shift                              # (B, D)

    feat_ref[...] = feature.astype(feat_ref.dtype)

    # Linear classifier (no bias): feature @ W^T with W^T pre-laid-out as (D, C).
    # bf16 MXU inputs, f32 accumulation.
    cls_ref[...] = jnp.dot(
        feature.astype(jnp.bfloat16),
        wt_ref[...].astype(jnp.bfloat16),
        preferred_element_type=jnp.float32,
    ).astype(cls_ref.dtype)


def bn_classifier(x, gamma, beta, w):
    """x: (B, D); gamma/beta: (D,); w: (C, D) (PyTorch nn.Linear weight layout)."""
    B, D = x.shape
    C = w.shape[0]
    gamma2 = gamma.reshape(1, D)
    beta2 = beta.reshape(1, D)
    wt = jnp.transpose(w)  # (D, C) — glue transpose stays in plain JAX

    vmem = pl.BlockSpec(memory_space=pltpu.MemorySpace.VMEM)
    feature, cls_score = pl.pallas_call(
        _bn_classifier_kernel,
        out_shape=(
            jax.ShapeDtypeStruct((B, D), x.dtype),
            jax.ShapeDtypeStruct((B, C), x.dtype),
        ),
        in_specs=[vmem, vmem, vmem, vmem],
        out_specs=(vmem, vmem),
    )(x, gamma2, beta2, wt)
    return feature, cls_score


def _reference_f32(x, gamma, beta, w):
    x = x.astype(jnp.float32)
    mean = jnp.mean(x, axis=0, keepdims=True)
    var = jnp.mean((x - mean) ** 2, axis=0, keepdims=True)
    feat = (x - mean) / jnp.sqrt(var + EPS) * gamma[None, :] + beta[None, :]
    return feat, feat @ w.T.astype(jnp.float32)


if __name__ == "__main__":
    # Small shapes consistent with the module's forward: (batch, in_dim).
    # D and C are kept multiples of 128 so outputs stay lane-dense.
    B, IN_DIM, CLASS_NUM = 8, 256, 128

    key = jax.random.PRNGKey(0)
    k_x, k_w = jax.random.split(key)

    x = jax.random.normal(k_x, (B, IN_DIM), dtype=jnp.float32)

    # Deterministic parameter init mirroring the PyTorch __init__:
    #   BatchNorm1d: weight=1, bias=0 (weights_init_kaiming)
    #   Linear: weight ~ Normal(std=0.001), no bias (weights_init_classifier)
    gamma = jnp.ones((IN_DIM,), dtype=jnp.float32)
    beta = jnp.zeros((IN_DIM,), dtype=jnp.float32)
    w = 0.001 * jax.random.normal(k_w, (CLASS_NUM, IN_DIM), dtype=jnp.float32)

    feature, cls_score = bn_classifier(x, gamma, beta, w)
    feature, cls_score = jax.block_until_ready((feature, cls_score))

    ref_feat, ref_cls_f32 = _reference_f32(x, gamma, beta, w)
    # Reference for the bf16-input / f32-accumulate classifier path.
    ref_cls_bf16 = jnp.dot(
        ref_feat.astype(jnp.bfloat16),
        w.T.astype(jnp.bfloat16),
        preferred_element_type=jnp.float32,
    )

    assert feature.shape == (B, IN_DIM) and cls_score.shape == (B, CLASS_NUM)
    # BN feature is computed fully in f32 -> tight tolerance.
    assert jnp.allclose(feature, ref_feat, atol=1e-4, rtol=1e-4)
    # Kernel matmul should match the same bf16-input/f32-acc computation tightly...
    assert jnp.allclose(cls_score, ref_cls_bf16, atol=1e-5, rtol=1e-3)
    # ...and the pure-f32 reference within bf16-rounding tolerance.
    assert jnp.allclose(cls_score, ref_cls_f32, atol=5e-4, rtol=2e-2)

    print("KERNEL_OK")
</pallas_src>

<mosaic_0001>
module attributes {stable_mosaic.version = 11 : i64} {
  func.func @_bn_classifier_kernel(%arg0: memref<8x256xf32, #tpu.memory_space<vmem>>, %arg1: memref<1x256xf32, #tpu.memory_space<vmem>>, %arg2: memref<1x256xf32, #tpu.memory_space<vmem>>, %arg3: memref<256x128xf32, #tpu.memory_space<vmem>>, %arg4: memref<8x256xf32, #tpu.memory_space<vmem>>, %arg5: memref<8x128xf32, #tpu.memory_space<vmem>>) attributes {dimension_semantics = [], scalar_prefetch = 0 : i64, scratch_operands = 0 : i64, tpu.core_type = #tpu.core_type<tc>} {
    %c0 = arith.constant 0 : index
    %c0_0 = arith.constant 0 : index
    %0 = vector.load %arg0[%c0, %c0_0] : memref<8x256xf32, #tpu.memory_space<vmem>>, vector<8x256xf32>
    %cst = arith.constant dense<0.000000e+00> : vector<256xf32>
    %1 = vector.multi_reduction <add>, %0, %cst [0] : vector<8x256xf32> to vector<256xf32>
    %2 = vector.shape_cast %1 : vector<256xf32> to vector<1x256xf32>
    %3 = arith.mulf %0, %0 : vector<8x256xf32>
    %cst_1 = arith.constant dense<0.000000e+00> : vector<256xf32>
    %4 = vector.multi_reduction <add>, %3, %cst_1 [0] : vector<8x256xf32> to vector<256xf32>
    %5 = vector.shape_cast %4 : vector<256xf32> to vector<1x256xf32>
    %cst_2 = arith.constant 1.250000e-01 : f32
    %6 = vector.broadcast %cst_2 : f32 to vector<1x256xf32>
    %7 = arith.mulf %2, %6 : vector<1x256xf32>
    %cst_3 = arith.constant 1.250000e-01 : f32
    %8 = vector.broadcast %cst_3 : f32 to vector<1x256xf32>
    %9 = arith.mulf %5, %8 : vector<1x256xf32>
    %10 = arith.mulf %7, %7 : vector<1x256xf32>
    %11 = arith.subf %9, %10 : vector<1x256xf32>
    %cst_4 = arith.constant 9.99999974E-6 : f32
    %12 = vector.broadcast %cst_4 : f32 to vector<1x256xf32>
    %13 = arith.addf %11, %12 : vector<1x256xf32>
    %14 = math.rsqrt %13 : vector<1x256xf32>
    %c0_5 = arith.constant 0 : index
    %c0_6 = arith.constant 0 : index
    %15 = vector.load %arg1[%c0_5, %c0_6] : memref<1x256xf32, #tpu.memory_space<vmem>>, vector<1x256xf32>
    %c0_7 = arith.constant 0 : index
    %c0_8 = arith.constant 0 : index
    %16 = vector.load %arg2[%c0_7, %c0_8] : memref<1x256xf32, #tpu.memory_space<vmem>>, vector<1x256xf32>
    %17 = arith.mulf %15, %14 : vector<1x256xf32>
    %18 = arith.mulf %7, %17 : vector<1x256xf32>
    %19 = arith.subf %16, %18 : vector<1x256xf32>
    %20 = vector.broadcast %17 : vector<1x256xf32> to vector<8x256xf32>
    %21 = arith.mulf %0, %20 : vector<8x256xf32>
    %22 = vector.broadcast %19 : vector<1x256xf32> to vector<8x256xf32>
    %23 = arith.addf %21, %22 : vector<8x256xf32>
    %c0_9 = arith.constant 0 : index
    %c0_10 = arith.constant 0 : index
    %24 = vector.load %arg4[%c0_9, %c0_10] : memref<8x256xf32, #tpu.memory_space<vmem>>, vector<8x256xf32>
    tpu.vector_store %arg4[%c0_9, %c0_10], %23 {strides = array<i32>} : memref<8x256xf32, #tpu.memory_space<vmem>>, vector<8x256xf32>,
    %25 = arith.truncf %23 : vector<8x256xf32> to vector<8x256xbf16>
    %c0_11 = arith.constant 0 : index
    %c0_12 = arith.constant 0 : index
    %26 = vector.load %arg3[%c0_11, %c0_12] : memref<256x128xf32, #tpu.memory_space<vmem>>, vector<256x128xf32>
    %27 = arith.truncf %26 : vector<256x128xf32> to vector<256x128xbf16>
    %cst_13 = arith.constant dense<0.000000e+00> : vector<8x128xf32>
    %28 = tpu.matmul %25, %27, %cst_13 {dimension_numbers = #tpu.dot_dimension_numbers<[1], [0], [0], [1], [0, 0, 1, 1], [], []>} : vector<8x256xbf16>, vector<256x128xbf16>, vector<8x128xf32> -> vector<8x128xf32>
    %c0_14 = arith.constant 0 : index
    %c0_15 = arith.constant 0 : index
    %29 = vector.load %arg5[%c0_14, %c0_15] : memref<8x128xf32, #tpu.memory_space<vmem>>, vector<8x128xf32>
    tpu.vector_store %arg5[%c0_14, %c0_15], %28 {strides = array<i32>} : memref<8x128xf32, #tpu.memory_space<vmem>>, vector<8x128xf32>,
    return
  }
}

</mosaic_0001>

<bundles_post_ra>
// kernel: tpu_custom_call.1
= control target key start
LH: loop header
LB: loop body
LE: loop exit
PB: predicated region body
PF: predicated region fallthrough
CT: control target
= control target key end

     0   :  { %11 = vsyncpa [#allocation3], 0  ;;  %s520_s0 = inlined_call_operand.hbm [shape: f32[8,256], index: 0, kind: input, shape index: {}]   ;;  %s521_s1 = inlined_call_operand.vmem [shape: f32[1,256], index: 1, kind: input, shape index: {}]   ;;  %s522_s2 = inlined_call_operand.vmem [shape: f32[1,256], index: 2, kind: input, shape index: {}]   ;;  %s523_s3 = inlined_call_operand.hbm [shape: f32[256,128], index: 3, kind: input, shape index: {}]   ;;  %s524_s4 = inlined_call_operand.hbm [shape: f32[8,256], index: 4, kind: output, shape index: {0}]   ;;  %s525_s5 = inlined_call_operand.hbm [shape: f32[8,128], index: 5, kind: output, shape index: {1}]  }
   0x1   :  { %12 = vsyncpa [#allocation6], 0 }
   0x2   :  { %13 = vsyncpa [#allocation4], 0 }
   0x3   :  { %14 = vsyncpa [#allocation9], 0  ;;  %s408_s18 = smov [#allocation2]   ;;  %s409_s20 = smov [#allocation5]  }
   0x4   :  { %s21_s19 = sshll.u32 %s408_s18, 4  ;;  %s34_s21 = sshll.u32 %s409_s20, 4  ;;  %s22_s19 = int_to_ptr.vmem [resolvable:$true] %s21_s19  ;;  %s445_s21 = int_to_ptr.vmem [resolvable:$true] %s34_s21 }
   0x5   :  { %s312_s24 = scalar_lea.hbm %s520_s0, 256 }
   0x6   :  { %p313_p0 = scmp.ne.s32.totalorder %s520_s0, %s312_s24  ;;  %p316_p1 = scmp.lt.u32.totalorder %s312_s24, %s520_s0 }
   0x8   :  { %p318_p2 = pnand %p316_p1, %p313_p0 }
   0xa   :  { %321 = shalt.err (!%p318_p2)
}
   0xb   :  { %s322_s29 = scalar_lea.vmem %s22_s19, 256  ;;  %p327_p4 = scmp.lt.s32.totalorder %s22_s19, %s22_s19 }
   0xc   :  { %p323_p3 = scmp.ne.s32.totalorder %s22_s19, %s322_s29  ;;  %p328_p5 = scmp.lt.s32.totalorder %s322_s29, %s322_s29 }
   0xe   :  { %p329_p6 = por %p328_p5, %p327_p4 }
  0x10   :  { %p330_p7 = pnand %p329_p6, %p323_p3 }
  0x12   :  { %333 = shalt.err (!%p330_p7)
}
  0x13   :  { %24 = dma.hbm_to_vmem [thread:$0]  %s520_s0, 256, %s22_s19, [#allocation3]  }
  0x14   :  { %s334_s9 = scalar_lea.hbm %s523_s3, 4096 }
  0x15   :  { %p335_p8 = scmp.ne.s32.totalorder %s523_s3, %s334_s9  ;;  %p338_p9 = scmp.lt.u32.totalorder %s334_s9, %s523_s3 }
  0x17   :  { %p340_p10 = pnand %p338_p9, %p335_p8 }
  0x19   :  { %343 = shalt.err (!%p340_p10)
}
  0x1a   :  { %s344_s14 = scalar_lea.vmem %s445_s21, 4096  ;;  %p349_p12 = scmp.lt.s32.totalorder %s445_s21, %s445_s21 }
  0x1b   :  { %p345_p11 = scmp.ne.s32.totalorder %s445_s21, %s344_s14  ;;  %p350_p13 = scmp.lt.s32.totalorder %s344_s14, %s344_s14 }
  0x1d   :  { %p351_p0 = por %p350_p13, %p349_p12 }
  0x1f   :  { %p352_p1 = pnand %p351_p0, %p345_p11 }
  0x21   :  { %355 = shalt.err (!%p352_p1)
}
  0x22   :  { %s410_s0 = smov 128   ;;  %s411_s15 = smov 8  }
  0x23   :  { %40 = dma.hbm_to_vmem [thread:$0]  %s523_s3, 4096, %s445_s21, [#allocation6], %s410_s0, %s410_s0, %s411_s15  }
  0x24   :  { %400 = dma.done.wait [#allocation3], 256  }
  0x25   :  { %401 = vsyncadd [#allocation3], 4294967040 }
  0x26   :  { %402 = dma.done.wait [#allocation6], 4096  }
  0x27   :  { %403 = vsyncadd [#allocation6], 4294963200  ;;  %v176_v0 = vld [vmem:[#allocation5 + $0x80] sm:$0xff]  ;;  %v177_v1 = vld [vmem:[#allocation5 + $0x88] sm:$0xff] }
  0x28   :  { %v160_v2 = vld [vmem:[#allocation5] sm:$0xff]  ;;  %v200_v3 = vpack.c.bf16 %v177_v1, %v176_v0  ;;  %v161_v4 = vld [vmem:[#allocation5 + $0x8] sm:$0xff]  ;;  %v178_v5 = vld [vmem:[#allocation5 + $0x90] sm:$0xff] }
  0x29   :  { %v179_v6 = vld [vmem:[#allocation5 + $0x98] sm:$0xff]  ;;  %v192_v7 = vpack.c.bf16 %v161_v4, %v160_v2  ;;  %v162_v9 = vld [vmem:[#allocation5 + $0x10] sm:$0xff]  ;;  %v180_v11 = vld [vmem:[#allocation5 + $0xa0] sm:$0xff] }
  0x2a   :  { %v201_v8 = vpack.c.bf16 %v179_v6, %v178_v5  ;;  %v163_v10 = vld [vmem:[#allocation5 + $0x18] sm:$0xff]  ;;  %279 = vmatprep.subr.bf16.mxu0 %v200_v3  ;;  %v181_v12 = vld [vmem:[#allocation5 + $0xa8] sm:$0xff]  ;;  %v164_v15 = vld [vmem:[#allocation5 + $0x20] sm:$0xff] }
  0x2b   :  { %280 = vmatpush3.bf16.msra.mxu0 %v192_v7  ;;  %v193_v13 = vpack.c.bf16 %v163_v10, %v162_v9  ;;  %v202_v14 = vpack.c.bf16 %v181_v12, %v180_v11  ;;  %v165_v16 = vld [vmem:[#allocation5 + $0x28] sm:$0xff]  ;;  %v182_v17 = vld [vmem:[#allocation5 + $0xb0] sm:$0xff]  ;;  %v183_v18 = vld [vmem:[#allocation5 + $0xb8] sm:$0xff] }
  0x2c   :  { %281 = vmatprep.subr.bf16.mxu0 %v201_v8  ;;  %v194_v19 = vpack.c.bf16 %v165_v16, %v164_v15  ;;  %v203_v20 = vpack.c.bf16 %v183_v18, %v182_v17  ;;  %v166_v21 = vld [vmem:[#allocation5 + $0x30] sm:$0xff]  ;;  %v167_v22 = vld [vmem:[#allocation5 + $0x38] sm:$0xff]  ;;  %v184_v23 = vld [vmem:[#allocation5 + $0xc0] sm:$0xff] }
  0x2d   :  { %v185_v24 = vld [vmem:[#allocation5 + $0xc8] sm:$0xff]  ;;  %v476_v25 = vld [vmem:[#allocation2] sm:$0xff]  ;;  %v478_v26 = vld [vmem:[#allocation2 + $0x8] sm:$0xff]  ;;  %v195_v29 = vpack.c.bf16 %v167_v22, %v166_v21  ;;  %v412_v22 = vmov 1966171168  }
  0x2e   :  { %v50_v27 = vrot.slane %v476_v25, 4  ;;  %v62_v28 = vmul.f32 %v476_v25, %v476_v25  ;;  %v56_v30 = vrot.slane %v478_v26, 4  ;;  %v63_v31 = vmul.f32 %v478_v26, %v478_v26  ;;  %v168_v33 = vld [vmem:[#allocation5 + $0x40] sm:$0xff]  ;;  %v169_v34 = vld [vmem:[#allocation5 + $0x48] sm:$0xff]  ;;  %v186_v37 = vld [vmem:[#allocation5 + $0xd0] sm:$0xff] }
  0x2f   :  { %282 = vmatpush3.bf16.msra.mxu0 %v193_v13  ;;  %v204_v32 = vpack.c.bf16 %v185_v24, %v184_v23  ;;  %v187_v38 = vld [vmem:[#allocation5 + $0xd8] sm:$0xff]  ;;  %v196_v43 = vpack.c.bf16 %v169_v34, %v168_v33  ;;  %v170_v47 = vld [vmem:[#allocation5 + $0x50] sm:$0xff]  ;;  %v188_v51 = vld [vmem:[#allocation5 + $0xe0] sm:$0xff]  ;;  %v94_v23 = vunpack.c.l.s4 %v412_v22  ;;  %v96_v24 = vlaneseq }
  0x30   :  { %283 = vmatprep.subr.bf16.mxu0 %v202_v14  ;;  %v51_v35 = vadd.f32 %v50_v27, %v476_v25  ;;  %v64_v36 = vrot.slane %v62_v28, 4  ;;  %v57_v39 = vadd.f32 %v56_v30, %v478_v26  ;;  %v70_v40 = vrot.slane %v63_v31, 4  ;;  %v171_v48 = vld [vmem:[#allocation5 + $0x58] sm:$0xff]  ;;  %v189_v52 = vld [vmem:[#allocation5 + $0xe8] sm:$0xff]  ;;  %v172_v61 = vld [vmem:[#allocation5 + $0x60] sm:$0xff] }
  0x31   :  { %v205_v46 = vpack.c.bf16 %v187_v38, %v186_v37  ;;  %v197_v57 = vpack.c.bf16 %v171_v48, %v170_v47  ;;  %v206_v60 = vpack.c.bf16 %v189_v52, %v188_v51  ;;  %v173_v62 = vld [vmem:[#allocation5 + $0x68] sm:$0xff]  ;;  %v190_v1 = vld [vmem:[#allocation5 + $0xf0] sm:$0xff]  ;;  %v191_v2 = vld [vmem:[#allocation5 + $0xf8] sm:$0xff]  ;;  %v95_v27 = vunpack.c.0.s8 %v94_v23 }
  0x32   :  { %v52_v41 = vrot.slane %v51_v35, 2  ;;  %v65_v42 = vadd.f32 %v64_v36, %v62_v28  ;;  %v58_v44 = vrot.slane %v57_v39, 2  ;;  %v71_v45 = vadd.f32 %v70_v40, %v63_v31  ;;  %v174_v11 = vld [vmem:[#allocation5 + $0x70] sm:$0xff]  ;;  %v175_v12 = vld [vmem:[#allocation5 + $0x78] sm:$0xff] }
  0x33   :  { %284 = vmatpush3.bf16.msra.mxu0 %v194_v19  ;;  %v198_v7 = vpack.c.bf16 %v173_v62, %v172_v61  ;;  %v207_v10 = vpack.c.bf16 %v191_v2, %v190_v1  ;;  %v199_v18 = vpack.c.bf16 %v175_v12, %v174_v11  ;;  %v97_v28 = vshrl.u32 %v96_v24, 7  ;;  %v88_v34 = vld [vmem:[%s521_s1] sm:$0x3]  ;;  %s413_s1 = smov [#allocation7]  }
  0x34   :  { %285 = vmatprep.subr.bf16.mxu0 %v203_v20  ;;  %v53_v49 = vadd.f32 %v52_v41, %v51_v35  ;;  %v66_v50 = vrot.slane %v65_v42, 2  ;;  %v59_v53 = vadd.f32 %v58_v44, %v57_v39  ;;  %v72_v54 = vrot.slane %v71_v45, 2  ;;  %s255_s21 = sshll.u32 %s413_s1, 4  ;;  %s256_s21 = int_to_ptr.vmem [resolvable:$true] %s255_s21 }
  0x35   :  { %v98_v30 = vsub.s32 %v95_v27, %v97_v28  ;;  %v112_v36 = vsub.s32 0, %v97_v28  ;;  %v116_v37 = vsub.s32 1, %v97_v28  ;;  %p361_p3 = scmp.lt.s32.totalorder %s256_s21, %s256_s21 }
  0x36   :  { %v54_v55 = vrot.slane %v53_v49, 1  ;;  %v67_v56 = vadd.f32 %v66_v50, %v65_v42  ;;  %v60_v58 = vrot.slane %v59_v53, 1  ;;  %v73_v59 = vadd.f32 %v72_v54, %v71_v45  ;;  %v89_v45 = vld [vmem:[%s522_s2] sm:$0x3]  ;;  %s356_s2 = scalar_lea.vmem %s256_s21, 256 }
  0x37   :  { %286 = vmatpush3.bf16.msra.mxu0 %v195_v29  ;;  %p357_p2 = scmp.ne.s32.totalorder %s256_s21, %s356_s2  ;;  %p362_p4 = scmp.lt.s32.totalorder %s356_s2, %s356_s2 }
  0x38   :  { %287 = vmatprep.subr.bf16.mxu0 %v204_v32  ;;  %v55_v63 = vadd.f32 %v54_v55, %v53_v49  ;;  %v68_v0 = vrot.slane %v67_v56, 1  ;;  %v61_v3 = vadd.f32 %v60_v58, %v59_v53  ;;  %v74_v4 = vrot.slane %v73_v59, 1 }
  0x39   :  { %p363_p5 = por %p362_p4, %p361_p3 }
  0x3a   :  { %v69_v5 = vadd.f32 %v68_v0, %v67_v56  ;;  %v76_v6 = vmul.f32 0.125, %v55_v63  ;;  %v75_v8 = vadd.f32 %v74_v4, %v73_v59  ;;  %v77_v9 = vmul.f32 0.125, %v61_v3 }
  0x3b   :  { %288 = vmatpush3.bf16.msra.mxu0 %v196_v43  ;;  %p364_p6 = pnand %p363_p5, %p357_p2 }
  0x3c   :  { %289 = vmatprep.subr.bf16.mxu0 %v205_v46  ;;  %v78_v13 = vmul.f32 0.125, %v69_v5  ;;  %v80_v14 = vmul.f32 %v76_v6, %v76_v6  ;;  %v79_v15 = vmul.f32 0.125, %v75_v8  ;;  %v81_v16 = vmul.f32 %v77_v9, %v77_v9 }
  0x3e   :  { %v82_v17 = vsub.f32 %v78_v13, %v80_v14  ;;  %v83_v19 = vsub.f32 %v79_v15, %v81_v16 }
  0x3f   :  { %290 = vmatpush3.bf16.msra.mxu0 %v197_v57 }
  0x40   :  { %291 = vmatprep.subr.bf16.mxu0 %v206_v60  ;;  %v84_v20 = vadd.f32 1e-05, %v82_v17  ;;  %v85_v21 = vadd.f32 1e-05, %v83_v19 }
  0x42   :  { %308 = vrsqrt.f32 %v84_v20 }
  0x43   :  { %292 = vmatpush3.bf16.msra.mxu0 %v198_v7  ;;  %310 = vrsqrt.f32 %v85_v21 }
  0x44   :  { %293 = vmatprep.subr.bf16.mxu0 %v207_v10 }
  0x47   :  { %294 = vmatpush3.bf16.msra.mxu0 %v199_v18 }
  0x4c   :  { %v309_v29 = vpop.eup %308 }
  0x4d   :  { %v311_v31 = vpop.eup %310 }
  0x4e   :  { %v92_v32 = vcombine.low %v309_v29, %v311_v31 }
  0x50   :  { %v99_v33 = vrot.slane %v92_v32, %v98_v30 }
  0x52   :  { %v106_v35 = vrot.slane %v99_v33, %v98_v30 }
  0x54   :  { %v108_v38 = vmul.f32 %v106_v35, %v88_v34 }
  0x56   :  { %v113_v39 = vrot.slane %v108_v38, %v112_v36  ;;  %v117_v40 = vrot.slane %v108_v38, %v116_v37 }
  0x58   :  { %v120_v41 = vmul.f32 %v113_v39, %v76_v6  ;;  %v121_v42 = vmul.f32 %v117_v40, %v77_v9  ;;  %v142_v48 = vmul.f32 %v117_v40, %v478_v26  ;;  %v141_v49 = vmul.f32 %v113_v39, %v476_v25 }
  0x5a   :  { %v124_v43 = vcombine.low %v120_v41, %v121_v42 }
  0x5c   :  { %v131_v44 = vrot.slane %v124_v43, %v98_v30 }
  0x5e   :  { %v138_v46 = vrot.slane %v131_v44, %v98_v30 }
  0x60   :  { %v140_v47 = vsub.f32 %v89_v45, %v138_v46 }
  0x62   :  { %v151_v50 = vrot.slane %v140_v47, %v116_v37  ;;  %v147_v51 = vrot.slane %v140_v47, %v112_v36 }
  0x64   :  { %v155_v52 = vadd.f32 %v151_v50, %v142_v48  ;;  %v154_v53 = vadd.f32 %v147_v51, %v141_v49 }
  0x66   :  { %v159_v54 = vpack.c.bf16 %v155_v52, %v155_v52  ;;  %157 = vst [vmem:[#allocation7 + $0x8] sm:$0xff] %v155_v52  ;;  %v158_v55 = vpack.c.bf16 %v154_v53, %v154_v53  ;;  %156 = vst [vmem:[#allocation7] sm:$0xff] %v154_v53 }
  0x68   :  { %240 = vmatprep.mubr.bf16.mxu0 %v159_v54 }
  0x69   :  { %241 = vmatmul.mubr.bf16.vlgmr.msra.gmra.mrb[0].mxu0 %v158_v55 }
  0x6a   :  { %367 = shalt.err (!%p364_p6)
}
  0x6b   :  { %s368_s24 = scalar_lea.hbm %s524_s4, 256 }
  0x6c   :  { %p369_p7 = scmp.ne.s32.totalorder %s524_s4, %s368_s24  ;;  %p372_p8 = scmp.lt.u32.totalorder %s368_s24, %s524_s4 }
  0x6e   :  { %p374_p9 = pnand %p372_p8, %p369_p7 }
  0x70   :  { %377 = shalt.err (!%p374_p9)
}
  0x71   :  { %258 = dma.vmem_to_hbm [thread:$0]  %s256_s21, 256, %s524_s4, [#allocation4]  }
  0x72   :  { %s414_s6 = smov [#allocation8]  }
  0x73   :  { %s265_s7 = sshll.u32 %s414_s6, 4  ;;  %s266_s7 = int_to_ptr.vmem [resolvable:$true] %s265_s7 }
  0x74   :  { %s378_s8 = scalar_lea.vmem %s266_s7, 128  ;;  %p383_p11 = scmp.lt.s32.totalorder %s266_s7, %s266_s7 }
  0x75   :  { %p379_p10 = scmp.ne.s32.totalorder %s266_s7, %s378_s8  ;;  %p384_p12 = scmp.lt.s32.totalorder %s378_s8, %s378_s8 }
  0x77   :  { %p385_p13 = por %p384_p12, %p383_p11 }
  0x79   :  { %p386_p0 = pnand %p385_p13, %p379_p10 }
 0x13c   :  { %v295_v25 = vpop.f32.mrb[0].mxu0 }
 0x13d   :  { %v296_v26 = vpop.f32.mrb[1].mxu0 }
 0x13e   :  { %v297_v56 = vadd.f32 %v296_v26, %v295_v25  ;;  %v298_v57 = vpop.f32.mrb[2].mxu0 }
 0x13f   :  { %v299_v58 = vpop.f32.mrb[3].mxu0 }
 0x140   :  { %248 = vst [vmem:[#allocation8] sm:$0xff] %v297_v56 }
 0x141   :  { %389 = shalt.err (!%p386_p0)
}
 0x142   :  { %s390_s4 = scalar_lea.hbm %s525_s5, 128 }
 0x143   :  { %p391_p1 = scmp.ne.s32.totalorder %s525_s5, %s390_s4  ;;  %p394_p2 = scmp.lt.u32.totalorder %s390_s4, %s525_s5 }
 0x145   :  { %p396_p3 = pnand %p394_p2, %p391_p1 }
 0x147   :  { %399 = shalt.err (!%p396_p3)
}
 0x148   :  { %268 = dma.vmem_to_hbm [thread:$0]  %s266_s7, 128, %s525_s5, [#allocation9]  }
 0x149   :  { %404 = dma.done.wait [#allocation4], 256  }
 0x14a   :  { %405 = vsyncadd [#allocation4], 4294967040 }
 0x14b   :  { %406 = dma.done.wait [#allocation9], 128  }
 0x14c   :  { %407 = vsyncadd [#allocation9], 4294967168 }
 0x14d   :  { %275 = vsyncpa [#allocation3], 1 }
 0x14e   :  { %276 = vsyncpa [#allocation6], 1 }
 0x14f   :  { %277 = vsyncpa [#allocation4], 1 }
 0x150   :  { %278 = vsyncpa [#allocation9], 1 }

</bundles_post_ra>
